<compile_context>
chip_gen: v7x
topology: tpu7x:2x2x1
jax: 0.10.0
libtpu: 0.0.40
codegen_flags: <defaults>
</compile_context>

<pallas_src>
import jax
import jax.numpy as jnp
from jax.experimental import pallas as pl
from jax.experimental.pallas import tpu as pltpu

# ----------------------------- model constants ------------------------------
N_DOC, N_AUTH = 16, 8          # number of 'document' / 'author' nodes
IN_DOC, IN_AUTH = 12, 6        # raw input feature dims per node type
HID = 32                       # hidden_channels (== per-head dim here)
HEADS = 4                      # attention heads
FEAT = HEADS * HID             # 128 -> lane-dense
OUT = 8                        # out_channels (classes)
LANE = 128                     # lane width; every slab is [*, 128]
SLOPE = 0.2                    # leaky_relu negative slope (PyG default)

VMEM_SPEC = pl.BlockSpec(memory_space=pltpu.MemorySpace.VMEM)


# ------------------------- packed-slab row layouts ---------------------------
def _build_layout(entries):
    off, cur = {}, 0
    for name, rows in entries:
        off[name] = cur
        cur += -(-rows // 8) * 8          # keep every block sublane(8)-aligned
    return off, cur


_PAR, PAR_ROWS = _build_layout([
    ("wproj", LANE), ("bstk", N_DOC + N_AUTH),
    ("adst_w", FEAT), ("asrc_w", FEAT), ("sel_w", N_AUTH), ("blk_w", HEADS * N_AUTH),
    ("adst_c", FEAT), ("asrc_c", FEAT), ("sel_c", N_DOC), ("blk_c", HEADS * N_DOC),
    ("kwt", FEAT), ("kb", 1), ("q", 1), ("owt", FEAT), ("ob", 1),
])
_DYN, DYN_ROWS = _build_layout([
    ("x", N_DOC + N_AUTH), ("adj_w", N_DOC), ("adj_c", N_DOC),
])


# ------------------------------ fused Pallas kernel ---------------------------
def _fused_han_kernel(dyn_ref, par_ref, o_ref):
    f32 = jnp.float32

    def par(name, rows):
        return par_ref[pl.ds(_PAR[name], rows), :]

    x_stk = dyn_ref[pl.ds(_DYN["x"], N_DOC + N_AUTH), :]            # [24,128]
    adj_w = dyn_ref[pl.ds(_DYN["adj_w"], N_DOC), :]                 # [16,128] (tiled / head)
    adj_c = dyn_ref[pl.ds(_DYN["adj_c"], N_DOC), :]                 # [16,128] (tiled / head)

    # fused (lin_dict -> HANConv proj) projection of BOTH node types in ONE matmul
    h_all = (jnp.dot(x_stk, par("wproj", LANE), preferred_element_type=f32)
             + par("bstk", N_DOC + N_AUTH))                          # [24,128]
    h_doc = h_all[:N_DOC, :]                                         # [16,128]
    h_auth = h_all[N_DOC:, :]                                        # [8,128]

    def edge_attention(x_src, x_dst, adj_exp, ns, adst, asrc, sel, blk):
        hns = HEADS * ns
        # All-head logits in [N_dst, HEADS*N_src] lane layout: lane h*ns+s <-> (head h, src s).
        # src part: one matmul + diagonal-select mask + sublane reduce (no transposes).
        p_src = jnp.dot(x_src, par(asrc, FEAT), preferred_element_type=f32)   # [ns,128]
        a_src_row = jnp.sum(p_src * par(sel, ns), axis=0, keepdims=True)      # [1,128]
        e = jnp.dot(x_dst, par(adst, FEAT), preferred_element_type=f32) + a_src_row
        e = jnp.where(e >= 0, e, SLOPE * e)                                   # leaky_relu
        m = jnp.max(e, axis=1, keepdims=True)                                 # shift (cancels)
        p = jnp.where(adj_exp > 0, jnp.exp(e - m), 0.0)                       # masked exp
        p = p[:, :hns]                                                        # lanes 0:hns (view)
        blk_m = par(blk, hns)                                                 # 0/1 head-block mask
        xs_blk = jnp.concatenate([x_src] * HEADS, axis=0) * blk_m             # [hns,128]
        raw = jnp.dot(p, xs_blk, preferred_element_type=f32)                  # [Nd,128]
        den = jnp.dot(p, blk_m, preferred_element_type=f32)                   # per-head row sums
        inv = pl.reciprocal(jnp.maximum(den, 1e-20), approx=True)             # deg-0 row -> 0
        return jnp.maximum(raw * inv, 0.0)                                    # relu

    out_w = edge_attention(h_auth, h_doc, adj_w, N_AUTH,
                           "adst_w", "asrc_w", "sel_w", "blk_w")              # [16,128]
    out_c = edge_attention(h_doc, h_doc, adj_c, N_DOC,
                           "adst_c", "asrc_c", "sel_c", "blk_c")              # [16,128]

    # semantic-level attention over the two edge types (one stacked k_lin matmul)
    cat = jnp.concatenate([out_w, out_c], axis=0)                             # [32,128]
    k = jnp.tanh(jnp.dot(cat, par("kwt", FEAT), preferred_element_type=f32)
                 + par("kb", 1))                                              # [32,128]
    rs = jnp.sum(k * par("q", 1), axis=1, keepdims=True)                      # [32,1]
    s_w = jnp.mean(rs[:N_DOC], axis=0, keepdims=True)                         # [1,1]
    s_c = jnp.mean(rs[N_DOC:], axis=0, keepdims=True)                         # [1,1]
    m2 = jnp.maximum(s_w, s_c)
    e_w = jnp.exp(s_w - m2)
    e_c = jnp.exp(s_c - m2)
    inv2 = pl.reciprocal(e_w + e_c, approx=True)
    doc = (e_w * inv2) * out_w + (e_c * inv2) * out_c                         # [16,128]

    # output head: lane-padded to 128 so the final store is dense
    o_ref[...] = (jnp.dot(doc, par("owt", FEAT), preferred_element_type=f32)
                  + par("ob", 1))


# --------------------------- parameter preparation ----------------------------
def prepare_params(params):
    """One-time plain-JAX prep: fold lin->proj, build per-head expansion matrices
    and 0/1 masks, and pack EVERYTHING into one lane-dense [PAR_ROWS,128] slab."""
    hp = jax.lax.Precision.HIGHEST
    lane = jnp.arange(LANE)
    feat = jnp.arange(FEAT)

    def fold(lin_w, lin_b, proj_w, proj_b):
        w = jnp.dot(proj_w, lin_w, precision=hp)                   # [FEAT, IN]
        b = jnp.dot(proj_w, lin_b, precision=hp) + proj_b          # [FEAT]
        return w.T, b

    def expand_attn(a, ns):    # a:[HEADS,HID] -> [FEAT,128]; lane h*ns+s carries head h
        vals = a[feat // HID, feat % HID]                          # [FEAT]
        msk = (((lane[None, :] // ns) == (feat[:, None] // HID))
               & (lane[None, :] < HEADS * ns))
        return vals[:, None] * msk.astype(jnp.float32)

    def sel_mask(ns):          # [ns,128]: 1 at (s, h*ns+s)  (diagonal select per head)
        s = jnp.arange(ns)
        m = ((lane[None, :] % ns) == s[:, None]) & (lane[None, :] < HEADS * ns)
        return m.astype(jnp.float32)

    def blk_mask(ns):          # [HEADS*ns,128]: 1 where feature col belongs to row's head
        r = jnp.arange(HEADS * ns)
        return ((feat[None, :] // HID) == (r[:, None] // ns)).astype(jnp.float32)

    wdocT, bdoc = fold(params['lin_doc_w'], params['lin_doc_b'],
                       params['proj_doc_w'], params['proj_doc_b'])
    wauthT, bauth = fold(params['lin_auth_w'], params['lin_auth_b'],
                         params['proj_auth_w'], params['proj_auth_b'])

    slab = jnp.zeros((PAR_ROWS, LANE), jnp.float32)

    def put(s, name, val):
        r0 = _PAR[name]
        return s.at[r0:r0 + val.shape[0], :val.shape[1]].set(val)

    slab = put(slab, "wproj", jnp.concatenate([wdocT, wauthT], axis=0))   # block-diag proj
    slab = put(slab, "bstk", jnp.concatenate(
        [jnp.broadcast_to(bdoc, (N_DOC, FEAT)),
         jnp.broadcast_to(bauth, (N_AUTH, FEAT))], axis=0))
    slab = put(slab, "adst_w", expand_attn(params['a_dst_writes'], N_AUTH))
    slab = put(slab, "asrc_w", expand_attn(params['a_src_writes'], N_AUTH))
    slab = put(slab, "sel_w", sel_mask(N_AUTH))
    slab = put(slab, "blk_w", blk_mask(N_AUTH))
    slab = put(slab, "adst_c", expand_attn(params['a_dst_cites'], N_DOC))
    slab = put(slab, "asrc_c", expand_attn(params['a_src_cites'], N_DOC))
    slab = put(slab, "sel_c", sel_mask(N_DOC))
    slab = put(slab, "blk_c", blk_mask(N_DOC))
    slab = put(slab, "kwt", params['k_lin_w'].T)
    slab = put(slab, "kb", params['k_lin_b'].reshape(1, FEAT))
    slab = put(slab, "q", params['q'].reshape(1, FEAT))
    slab = put(slab, "owt", params['out_w'].T)                            # lanes 0:OUT
    slab = put(slab, "ob", params['out_b'].reshape(1, OUT))
    return slab


# ------------------------------ forward (wrapper) ------------------------------
@jax.jit
def han_forward(par_slab, x_doc_raw, x_auth_raw, adj_writes, adj_cites):
    # pack all runtime-varying data into ONE lane-dense [56,128] slab (1 DMA)
    dyn = jnp.zeros((DYN_ROWS, LANE), jnp.float32)
    dyn = dyn.at[_DYN["x"]:_DYN["x"] + N_DOC, :IN_DOC].set(x_doc_raw)
    dyn = dyn.at[_DYN["x"] + N_DOC:_DYN["x"] + N_DOC + N_AUTH,
                 IN_DOC:IN_DOC + IN_AUTH].set(x_auth_raw)
    dyn = dyn.at[_DYN["adj_w"]:_DYN["adj_w"] + N_DOC,
                 :HEADS * N_AUTH].set(jnp.tile(adj_writes, (1, HEADS)))
    dyn = dyn.at[_DYN["adj_c"]:_DYN["adj_c"] + N_DOC,
                 :HEADS * N_DOC].set(jnp.tile(adj_cites, (1, HEADS)))

    out_pad = pl.pallas_call(
        _fused_han_kernel,
        out_shape=jax.ShapeDtypeStruct((N_DOC, LANE), jnp.float32),
        in_specs=[VMEM_SPEC, VMEM_SPEC],
        out_specs=VMEM_SPEC,
    )(dyn, par_slab)
    return out_pad[:, :OUT]


# --------------------------- pure-JAX reference (unfused) ---------------------
def _ref_linear(x, w, b):
    return jnp.dot(x, w.T, precision=jax.lax.Precision.HIGHEST) + b


def _ref_edge_attn(x_src, x_dst, a_src, a_dst, adj):
    outs = []
    for h in range(HEADS):
        xs = x_src[:, h * HID:(h + 1) * HID]
        xd = x_dst[:, h * HID:(h + 1) * HID]
        als = (xs * a_src[h]).sum(-1)                 # [Ns]
        ald = (xd * a_dst[h]).sum(-1)                 # [Nd]
        e = ald[:, None] + als[None, :]
        e = jnp.where(e >= 0, e, SLOPE * e)
        e = jnp.where(adj > 0, e, -1e30)
        p = jnp.exp(e - e.max(1, keepdims=True)) * adj
        attn = p / jnp.maximum(p.sum(1, keepdims=True), 1e-20)
        outs.append(jnp.maximum(
            jnp.dot(attn, xs, precision=jax.lax.Precision.HIGHEST), 0.0))
    return jnp.concatenate(outs, axis=1)


def _ref_forward(params, x_doc_raw, x_auth_raw, adj_writes, adj_cites):
    x_doc = _ref_linear(x_doc_raw, params['lin_doc_w'], params['lin_doc_b'])
    x_auth = _ref_linear(x_auth_raw, params['lin_auth_w'], params['lin_auth_b'])
    h_doc = _ref_linear(x_doc, params['proj_doc_w'], params['proj_doc_b'])
    h_auth = _ref_linear(x_auth, params['proj_auth_w'], params['proj_auth_b'])
    out_writes = _ref_edge_attn(h_auth, h_doc, params['a_src_writes'],
                                params['a_dst_writes'], adj_writes)
    out_cites = _ref_edge_attn(h_doc, h_doc, params['a_src_cites'],
                               params['a_dst_cites'], adj_cites)
    scores = []
    for o in (out_writes, out_cites):
        k = jnp.tanh(_ref_linear(o, params['k_lin_w'], params['k_lin_b'])).mean(0)
        scores.append((k * params['q'][0]).sum())
    attn = jax.nn.softmax(jnp.stack(scores))
    doc = attn[0] * out_writes + attn[1] * out_cites
    return _ref_linear(doc, params['out_w'], params['out_b'])


# ----------------------------------- main -------------------------------------
if __name__ == "__main__":
    key = jax.random.PRNGKey(0)
    keys = jax.random.split(key, 20)

    def nrm(k, shape, scale=0.1):
        return scale * jax.random.normal(k, shape, jnp.float32)

    params = {
        'lin_doc_w': nrm(keys[0], (HID, IN_DOC)),  'lin_doc_b': nrm(keys[1], (HID,)),
        'lin_auth_w': nrm(keys[2], (HID, IN_AUTH)), 'lin_auth_b': nrm(keys[3], (HID,)),
        'proj_doc_w': nrm(keys[4], (FEAT, HID)),   'proj_doc_b': nrm(keys[5], (FEAT,)),
        'proj_auth_w': nrm(keys[6], (FEAT, HID)),  'proj_auth_b': nrm(keys[7], (FEAT,)),
        'a_src_writes': nrm(keys[8], (HEADS, HID)), 'a_dst_writes': nrm(keys[9], (HEADS, HID)),
        'a_src_cites': nrm(keys[10], (HEADS, HID)), 'a_dst_cites': nrm(keys[11], (HEADS, HID)),
        'k_lin_w': nrm(keys[12], (FEAT, FEAT)),    'k_lin_b': nrm(keys[13], (FEAT,)),
        'q': nrm(keys[14], (1, FEAT)),
        'out_w': nrm(keys[15], (OUT, FEAT)),       'out_b': nrm(keys[16], (OUT,)),
    }

    # raw node features (x_dict)
    x_doc_raw = jax.random.normal(keys[17], (N_DOC, IN_DOC), jnp.float32)
    x_auth_raw = jax.random.normal(keys[18], (N_AUTH, IN_AUTH), jnp.float32)

    # edge_index_dict -> dense adjacency masks [num_dst, num_src] (JAX glue)
    writes_src = jnp.array([0, 1, 2, 3, 4, 5, 6, 7, 0, 1, 2, 3, 4, 5, 6, 7, 0, 2, 4, 6],
                           jnp.int32)
    writes_dst = jnp.array([0, 1, 2, 3, 4, 5, 6, 7, 8, 9, 10, 11, 12, 13, 14, 15, 1, 3, 5, 7],
                           jnp.int32)
    cites_src = jnp.array([(i + 1) % N_DOC for i in range(N_DOC)] + [0, 5, 10], jnp.int32)
    cites_dst = jnp.array(list(range(N_DOC)) + [8, 12, 3], jnp.int32)

    adj_writes = jnp.zeros((N_DOC, N_AUTH), jnp.float32).at[writes_dst, writes_src].set(1.0)
    adj_cites = jnp.zeros((N_DOC, N_DOC), jnp.float32).at[cites_dst, cites_src].set(1.0)

    par_slab = prepare_params(params)                # one-time param prep (plain JAX)
    out = han_forward(par_slab, x_doc_raw, x_auth_raw, adj_writes, adj_cites)
    out = jax.block_until_ready(out)

    ref = _ref_forward(params, x_doc_raw, x_auth_raw, adj_writes, adj_cites)
    assert out.shape == (N_DOC, OUT), out.shape
    assert jnp.allclose(out, ref, atol=1e-3, rtol=1e-3), (
        f"max abs err = {jnp.max(jnp.abs(out - ref))}")

    print("KERNEL_OK")
</pallas_src>

<mosaic_0001>
module attributes {stable_mosaic.version = 11 : i64} {
  func.func @_fused_han_kernel(%arg0: memref<56x128xf32, #tpu.memory_space<vmem>>, %arg1: memref<1064x128xf32, #tpu.memory_space<vmem>>, %arg2: memref<16x128xf32, #tpu.memory_space<vmem>>) attributes {dimension_semantics = [], scalar_prefetch = 0 : i64, scratch_operands = 0 : i64, tpu.core_type = #tpu.core_type<tc>} {
    %c0 = arith.constant 0 : index
    %c0_0 = arith.constant 0 : index
    %0 = vector.load %arg0[%c0, %c0_0] : memref<56x128xf32, #tpu.memory_space<vmem>>, vector<24x128xf32>
    %c24 = arith.constant 24 : index
    %c0_1 = arith.constant 0 : index
    %1 = vector.load %arg0[%c24, %c0_1] : memref<56x128xf32, #tpu.memory_space<vmem>>, vector<16x128xf32>
    %c40 = arith.constant 40 : index
    %c0_2 = arith.constant 0 : index
    %2 = vector.load %arg0[%c40, %c0_2] : memref<56x128xf32, #tpu.memory_space<vmem>>, vector<16x128xf32>
    %c0_3 = arith.constant 0 : index
    %c0_4 = arith.constant 0 : index
    %3 = vector.load %arg1[%c0_3, %c0_4] : memref<1064x128xf32, #tpu.memory_space<vmem>>, vector<128x128xf32>
    %cst = arith.constant dense<0.000000e+00> : vector<24x128xf32>
    %4 = tpu.matmul %0, %3, %cst {dimension_numbers = #tpu.dot_dimension_numbers<[1], [0], [0], [1], [0, 0, 1, 1], [], []>} : vector<24x128xf32>, vector<128x128xf32>, vector<24x128xf32> -> vector<24x128xf32>
    %c128 = arith.constant 128 : index
    %c0_5 = arith.constant 0 : index
    %5 = vector.load %arg1[%c128, %c0_5] : memref<1064x128xf32, #tpu.memory_space<vmem>>, vector<24x128xf32>
    %6 = arith.addf %4, %5 : vector<24x128xf32>
    %7 = vector.extract_strided_slice %6 {offsets = [0, 0], sizes = [16, 128], strides = [1, 1]} : vector<24x128xf32> to vector<16x128xf32>
    %8 = vector.extract_strided_slice %6 {offsets = [16, 0], sizes = [8, 128], strides = [1, 1]} : vector<24x128xf32> to vector<8x128xf32>
    %c280 = arith.constant 280 : index
    %c0_6 = arith.constant 0 : index
    %9 = vector.load %arg1[%c280, %c0_6] : memref<1064x128xf32, #tpu.memory_space<vmem>>, vector<128x128xf32>
    %cst_7 = arith.constant dense<0.000000e+00> : vector<8x128xf32>
    %10 = tpu.matmul %8, %9, %cst_7 {dimension_numbers = #tpu.dot_dimension_numbers<[1], [0], [0], [1], [0, 0, 1, 1], [], []>} : vector<8x128xf32>, vector<128x128xf32>, vector<8x128xf32> -> vector<8x128xf32>
    %c408 = arith.constant 408 : index
    %c0_8 = arith.constant 0 : index
    %11 = vector.load %arg1[%c408, %c0_8] : memref<1064x128xf32, #tpu.memory_space<vmem>>, vector<8x128xf32>
    %12 = arith.mulf %10, %11 : vector<8x128xf32>
    %cst_9 = arith.constant dense<0.000000e+00> : vector<128xf32>
    %13 = vector.multi_reduction <add>, %12, %cst_9 [0] : vector<8x128xf32> to vector<128xf32>
    %14 = vector.shape_cast %13 : vector<128xf32> to vector<1x128xf32>
    %c152 = arith.constant 152 : index
    %c0_10 = arith.constant 0 : index
    %15 = vector.load %arg1[%c152, %c0_10] : memref<1064x128xf32, #tpu.memory_space<vmem>>, vector<128x128xf32>
    %cst_11 = arith.constant dense<0.000000e+00> : vector<16x128xf32>
    %16 = tpu.matmul %7, %15, %cst_11 {dimension_numbers = #tpu.dot_dimension_numbers<[1], [0], [0], [1], [0, 0, 1, 1], [], []>} : vector<16x128xf32>, vector<128x128xf32>, vector<16x128xf32> -> vector<16x128xf32>
    %17 = vector.broadcast %14 : vector<1x128xf32> to vector<16x128xf32>
    %18 = arith.addf %16, %17 : vector<16x128xf32>
    %cst_12 = arith.constant 0.000000e+00 : f32
    %19 = vector.broadcast %cst_12 : f32 to vector<16x128xf32>
    %20 = arith.cmpf oge, %18, %19 : vector<16x128xf32>
    %cst_13 = arith.constant 2.000000e-01 : f32
    %21 = vector.broadcast %cst_13 : f32 to vector<16x128xf32>
    %22 = arith.mulf %21, %18 : vector<16x128xf32>
    %23 = arith.select %20, %18, %22 : vector<16x128xi1>, vector<16x128xf32>
    %cst_14 = arith.constant dense<0xFF800000> : vector<16xf32>
    %24 = vector.multi_reduction <maximumf>, %23, %cst_14 [1] : vector<16x128xf32> to vector<16xf32>
    %25 = vector.shape_cast %24 : vector<16xf32> to vector<16x1xf32>
    %cst_15 = arith.constant 0.000000e+00 : f32
    %26 = vector.broadcast %cst_15 : f32 to vector<16x128xf32>
    %27 = arith.cmpf ogt, %1, %26 : vector<16x128xf32>
    %28 = vector.broadcast %25 : vector<16x1xf32> to vector<16x128xf32>
    %29 = arith.subf %23, %28 : vector<16x128xf32>
    %30 = math.exp %29 : vector<16x128xf32>
    %cst_16 = arith.constant 0.000000e+00 : f32
    %31 = vector.broadcast %cst_16 : f32 to vector<16x128xf32>
    %32 = arith.select %27, %30, %31 : vector<16x128xi1>, vector<16x128xf32>
    %33 = vector.extract_strided_slice %32 {offsets = [0, 0], sizes = [16, 32], strides = [1, 1]} : vector<16x128xf32> to vector<16x32xf32>
    %c416 = arith.constant 416 : index
    %c0_17 = arith.constant 0 : index
    %34 = vector.load %arg1[%c416, %c0_17] : memref<1064x128xf32, #tpu.memory_space<vmem>>, vector<32x128xf32>
    %35 = tpu.concatenate %8, %8, %8, %8 in 0 : vector<8x128xf32>, vector<8x128xf32>, vector<8x128xf32>, vector<8x128xf32> -> vector<32x128xf32>
    %36 = arith.mulf %35, %34 : vector<32x128xf32>
    %cst_18 = arith.constant dense<0.000000e+00> : vector<16x128xf32>
    %37 = tpu.matmul %33, %36, %cst_18 {dimension_numbers = #tpu.dot_dimension_numbers<[1], [0], [0], [1], [0, 0, 1, 1], [], []>} : vector<16x32xf32>, vector<32x128xf32>, vector<16x128xf32> -> vector<16x128xf32>
    %cst_19 = arith.constant dense<0.000000e+00> : vector<16x128xf32>
    %38 = tpu.matmul %33, %34, %cst_19 {dimension_numbers = #tpu.dot_dimension_numbers<[1], [0], [0], [1], [0, 0, 1, 1], [], []>} : vector<16x32xf32>, vector<32x128xf32>, vector<16x128xf32> -> vector<16x128xf32>
    %cst_20 = arith.constant 9.99999968E-21 : f32
    %39 = vector.broadcast %cst_20 : f32 to vector<16x128xf32>
    %40 = arith.maximumf %38, %39 : vector<16x128xf32>
    %41 = tpu.reciprocal %40 {approx = true} : vector<16x128xf32> -> vector<16x128xf32>
    %42 = arith.mulf %37, %41 : vector<16x128xf32>
    %cst_21 = arith.constant 0.000000e+00 : f32
    %43 = vector.broadcast %cst_21 : f32 to vector<16x128xf32>
    %44 = arith.maximumf %42, %43 : vector<16x128xf32>
    %c576 = arith.constant 576 : index
    %c0_22 = arith.constant 0 : index
    %45 = vector.load %arg1[%c576, %c0_22] : memref<1064x128xf32, #tpu.memory_space<vmem>>, vector<128x128xf32>
    %cst_23 = arith.constant dense<0.000000e+00> : vector<16x128xf32>
    %46 = tpu.matmul %7, %45, %cst_23 {dimension_numbers = #tpu.dot_dimension_numbers<[1], [0], [0], [1], [0, 0, 1, 1], [], []>} : vector<16x128xf32>, vector<128x128xf32>, vector<16x128xf32> -> vector<16x128xf32>
    %c704 = arith.constant 704 : index
    %c0_24 = arith.constant 0 : index
    %47 = vector.load %arg1[%c704, %c0_24] : memref<1064x128xf32, #tpu.memory_space<vmem>>, vector<16x128xf32>
    %48 = arith.mulf %46, %47 : vector<16x128xf32>
    %cst_25 = arith.constant dense<0.000000e+00> : vector<128xf32>
    %49 = vector.multi_reduction <add>, %48, %cst_25 [0] : vector<16x128xf32> to vector<128xf32>
    %50 = vector.shape_cast %49 : vector<128xf32> to vector<1x128xf32>
    %c448 = arith.constant 448 : index
    %c0_26 = arith.constant 0 : index
    %51 = vector.load %arg1[%c448, %c0_26] : memref<1064x128xf32, #tpu.memory_space<vmem>>, vector<128x128xf32>
    %cst_27 = arith.constant dense<0.000000e+00> : vector<16x128xf32>
    %52 = tpu.matmul %7, %51, %cst_27 {dimension_numbers = #tpu.dot_dimension_numbers<[1], [0], [0], [1], [0, 0, 1, 1], [], []>} : vector<16x128xf32>, vector<128x128xf32>, vector<16x128xf32> -> vector<16x128xf32>
    %53 = vector.broadcast %50 : vector<1x128xf32> to vector<16x128xf32>
    %54 = arith.addf %52, %53 : vector<16x128xf32>
    %cst_28 = arith.constant 0.000000e+00 : f32
    %55 = vector.broadcast %cst_28 : f32 to vector<16x128xf32>
    %56 = arith.cmpf oge, %54, %55 : vector<16x128xf32>
    %cst_29 = arith.constant 2.000000e-01 : f32
    %57 = vector.broadcast %cst_29 : f32 to vector<16x128xf32>
    %58 = arith.mulf %57, %54 : vector<16x128xf32>
    %59 = arith.select %56, %54, %58 : vector<16x128xi1>, vector<16x128xf32>
    %cst_30 = arith.constant dense<0xFF800000> : vector<16xf32>
    %60 = vector.multi_reduction <maximumf>, %59, %cst_30 [1] : vector<16x128xf32> to vector<16xf32>
    %61 = vector.shape_cast %60 : vector<16xf32> to vector<16x1xf32>
    %cst_31 = arith.constant 0.000000e+00 : f32
    %62 = vector.broadcast %cst_31 : f32 to vector<16x128xf32>
    %63 = arith.cmpf ogt, %2, %62 : vector<16x128xf32>
    %64 = vector.broadcast %61 : vector<16x1xf32> to vector<16x128xf32>
    %65 = arith.subf %59, %64 : vector<16x128xf32>
    %66 = math.exp %65 : vector<16x128xf32>
    %cst_32 = arith.constant 0.000000e+00 : f32
    %67 = vector.broadcast %cst_32 : f32 to vector<16x128xf32>
    %68 = arith.select %63, %66, %67 : vector<16x128xi1>, vector<16x128xf32>
    %69 = vector.extract_strided_slice %68 {offsets = [0, 0], sizes = [16, 64], strides = [1, 1]} : vector<16x128xf32> to vector<16x64xf32>
    %c720 = arith.constant 720 : index
    %c0_33 = arith.constant 0 : index
    %70 = vector.load %arg1[%c720, %c0_33] : memref<1064x128xf32, #tpu.memory_space<vmem>>, vector<64x128xf32>
    %71 = tpu.concatenate %7, %7, %7, %7 in 0 : vector<16x128xf32>, vector<16x128xf32>, vector<16x128xf32>, vector<16x128xf32> -> vector<64x128xf32>
    %72 = arith.mulf %71, %70 : vector<64x128xf32>
    %cst_34 = arith.constant dense<0.000000e+00> : vector<16x128xf32>
    %73 = tpu.matmul %69, %72, %cst_34 {dimension_numbers = #tpu.dot_dimension_numbers<[1], [0], [0], [1], [0, 0, 1, 1], [], []>} : vector<16x64xf32>, vector<64x128xf32>, vector<16x128xf32> -> vector<16x128xf32>
    %cst_35 = arith.constant dense<0.000000e+00> : vector<16x128xf32>
    %74 = tpu.matmul %69, %70, %cst_35 {dimension_numbers = #tpu.dot_dimension_numbers<[1], [0], [0], [1], [0, 0, 1, 1], [], []>} : vector<16x64xf32>, vector<64x128xf32>, vector<16x128xf32> -> vector<16x128xf32>
    %cst_36 = arith.constant 9.99999968E-21 : f32
    %75 = vector.broadcast %cst_36 : f32 to vector<16x128xf32>
    %76 = arith.maximumf %74, %75 : vector<16x128xf32>
    %77 = tpu.reciprocal %76 {approx = true} : vector<16x128xf32> -> vector<16x128xf32>
    %78 = arith.mulf %73, %77 : vector<16x128xf32>
    %cst_37 = arith.constant 0.000000e+00 : f32
    %79 = vector.broadcast %cst_37 : f32 to vector<16x128xf32>
    %80 = arith.maximumf %78, %79 : vector<16x128xf32>
    %81 = tpu.concatenate %44, %80 in 0 : vector<16x128xf32>, vector<16x128xf32> -> vector<32x128xf32>
    %c784 = arith.constant 784 : index
    %c0_38 = arith.constant 0 : index
    %82 = vector.load %arg1[%c784, %c0_38] : memref<1064x128xf32, #tpu.memory_space<vmem>>, vector<128x128xf32>
    %cst_39 = arith.constant dense<0.000000e+00> : vector<32x128xf32>
    %83 = tpu.matmul %81, %82, %cst_39 {dimension_numbers = #tpu.dot_dimension_numbers<[1], [0], [0], [1], [0, 0, 1, 1], [], []>} : vector<32x128xf32>, vector<128x128xf32>, vector<32x128xf32> -> vector<32x128xf32>
    %c912 = arith.constant 912 : index
    %c0_40 = arith.constant 0 : index
    %84 = vector.load %arg1[%c912, %c0_40] : memref<1064x128xf32, #tpu.memory_space<vmem>>, vector<1x128xf32>
    %85 = vector.broadcast %84 : vector<1x128xf32> to vector<32x128xf32>
    %86 = arith.addf %83, %85 : vector<32x128xf32>
    %87 = math.tanh %86 : vector<32x128xf32>
    %c920 = arith.constant 920 : index
    %c0_41 = arith.constant 0 : index
    %88 = vector.load %arg1[%c920, %c0_41] : memref<1064x128xf32, #tpu.memory_space<vmem>>, vector<1x128xf32>
    %89 = vector.broadcast %88 : vector<1x128xf32> to vector<32x128xf32>
    %90 = arith.mulf %87, %89 : vector<32x128xf32>
    %cst_42 = arith.constant dense<0.000000e+00> : vector<32xf32>
    %91 = vector.multi_reduction <add>, %90, %cst_42 [1] : vector<32x128xf32> to vector<32xf32>
    %92 = vector.shape_cast %91 : vector<32xf32> to vector<32x1xf32>
    %93 = vector.extract_strided_slice %92 {offsets = [0, 0], sizes = [16, 1], strides = [1, 1]} : vector<32x1xf32> to vector<16x1xf32>
    %cst_43 = arith.constant dense<0.000000e+00> : vector<1xf32>
    %94 = vector.multi_reduction <add>, %93, %cst_43 [0] : vector<16x1xf32> to vector<1xf32>
    %95 = vector.shape_cast %94 : vector<1xf32> to vector<1x1xf32>
    %cst_44 = arith.constant 1.600000e+01 : f32
    %96 = vector.broadcast %cst_44 : f32 to vector<1x1xf32>
    %97 = arith.divf %95, %96 : vector<1x1xf32>
    %98 = vector.extract_strided_slice %92 {offsets = [16, 0], sizes = [16, 1], strides = [1, 1]} : vector<32x1xf32> to vector<16x1xf32>
    %cst_45 = arith.constant dense<0.000000e+00> : vector<1xf32>
    %99 = vector.multi_reduction <add>, %98, %cst_45 [0] : vector<16x1xf32> to vector<1xf32>
    %100 = vector.shape_cast %99 : vector<1xf32> to vector<1x1xf32>
    %cst_46 = arith.constant 1.600000e+01 : f32
    %101 = vector.broadcast %cst_46 : f32 to vector<1x1xf32>
    %102 = arith.divf %100, %101 : vector<1x1xf32>
    %103 = arith.maximumf %97, %102 : vector<1x1xf32>
    %104 = arith.subf %97, %103 : vector<1x1xf32>
    %105 = math.exp %104 : vector<1x1xf32>
    %106 = arith.subf %102, %103 : vector<1x1xf32>
    %107 = math.exp %106 : vector<1x1xf32>
    %108 = arith.addf %105, %107 : vector<1x1xf32>
    %109 = tpu.reciprocal %108 {approx = true} : vector<1x1xf32> -> vector<1x1xf32>
    %110 = arith.mulf %105, %109 : vector<1x1xf32>
    %111 = vector.broadcast %110 : vector<1x1xf32> to vector<16x128xf32>
    %112 = arith.mulf %111, %44 : vector<16x128xf32>
    %113 = arith.mulf %107, %109 : vector<1x1xf32>
    %114 = vector.broadcast %113 : vector<1x1xf32> to vector<16x128xf32>
    %115 = arith.mulf %114, %80 : vector<16x128xf32>
    %116 = arith.addf %112, %115 : vector<16x128xf32>
    %c928 = arith.constant 928 : index
    %c0_47 = arith.constant 0 : index
    %117 = vector.load %arg1[%c928, %c0_47] : memref<1064x128xf32, #tpu.memory_space<vmem>>, vector<128x128xf32>
    %cst_48 = arith.constant dense<0.000000e+00> : vector<16x128xf32>
    %118 = tpu.matmul %116, %117, %cst_48 {dimension_numbers = #tpu.dot_dimension_numbers<[1], [0], [0], [1], [0, 0, 1, 1], [], []>} : vector<16x128xf32>, vector<128x128xf32>, vector<16x128xf32> -> vector<16x128xf32>
    %c1056 = arith.constant 1056 : index
    %c0_49 = arith.constant 0 : index
    %119 = vector.load %arg1[%c1056, %c0_49] : memref<1064x128xf32, #tpu.memory_space<vmem>>, vector<1x128xf32>
    %120 = vector.broadcast %119 : vector<1x128xf32> to vector<16x128xf32>
    %121 = arith.addf %118, %120 : vector<16x128xf32>
    %c0_50 = arith.constant 0 : index
    %c0_51 = arith.constant 0 : index
    %122 = vector.load %arg2[%c0_50, %c0_51] : memref<16x128xf32, #tpu.memory_space<vmem>>, vector<16x128xf32>
    tpu.vector_store %arg2[%c0_50, %c0_51], %121 {strides = array<i32>} : memref<16x128xf32, #tpu.memory_space<vmem>>, vector<16x128xf32>,
    return
  }
}

</mosaic_0001>

<bundles_post_ra>
// kernel: han_forward.1
= control target key start
LH: loop header
LB: loop body
LE: loop exit
PB: predicated region body
PF: predicated region fallthrough
CT: control target
= control target key end

     0   :  { %7 = vsyncpa [#allocation3], 0  ;;  %s1968_s9 = smov [#allocation2]   ;;  %s2144_s0 = inlined_call_operand.vmem [shape: f32[56,128], index: 0, kind: input, shape index: {}]   ;;  %s2145_s1 = inlined_call_operand.hbm [shape: f32[1064,128], index: 1, kind: input, shape index: {}]   ;;  %s2146_s2 = inlined_call_operand.vmem [shape: f32[16,128], index: 2, kind: output, shape index: {}]  }
   0x1   :  { %s15_s10 = sshll.u32 %s1968_s9, 4  ;;  %s1944_s13 = scalar_lea.hbm %s2145_s1, 17024  ;;  %s16_s10 = int_to_ptr.vmem [resolvable:$true] %s15_s10 }
   0x2   :  { %p1945_p0 = scmp.ne.s32.totalorder %s2145_s1, %s1944_s13  ;;  %p1948_p1 = scmp.lt.u32.totalorder %s1944_s13, %s2145_s1 }
   0x4   :  { %p1950_p2 = pnand %p1948_p1, %p1945_p0 }
   0x6   :  { %1953 = shalt.err (!%p1950_p2)
}
   0x7   :  { %s1954_s18 = scalar_lea.vmem %s16_s10, 17024  ;;  %p1959_p4 = scmp.lt.s32.totalorder %s16_s10, %s16_s10 }
   0x8   :  { %p1955_p3 = scmp.ne.s32.totalorder %s16_s10, %s1954_s18  ;;  %p1960_p5 = scmp.lt.s32.totalorder %s1954_s18, %s1954_s18 }
   0xa   :  { %p1961_p6 = por %p1960_p5, %p1959_p4 }
   0xc   :  { %p1962_p7 = pnand %p1961_p6, %p1955_p3 }
   0xe   :  { %1965 = shalt.err (!%p1962_p7)
}
   0xf   :  { %s1969_s19 = smov 128   ;;  %s1970_s20 = smov 8  }
  0x10   :  { %21 = dma.hbm_to_vmem [thread:$0]  %s2145_s1, 17024, %s16_s10, [#allocation3], %s1969_s19, %s1969_s19, %s1970_s20  }
  0x11   :  { %1966 = dma.done.wait [#allocation3], 17024  }
  0x12   :  { %1967 = vsyncadd [#allocation3], 4294950272  ;;  %v1971_v0 = vmov 0.0|0.0   ;;  %vm1972_vm0 = vmmov 0   ;;  %v1973_v1 = vmov 0.0   ;;  %v32_v2 = vld [vmem:[#allocation2] sm:$0xff] }
  0x13   :  { %1652 = vmatprep.subr.bf16.mxu0 %v1971_v0  ;;  %1370 = vmatprep.mubr.msk.f32.mxu0 %vm1972_vm0, %v1973_v1  ;;  %v33_v3 = vld [vmem:[#allocation2 + $0x8] sm:$0xff]  ;;  %v34_v4 = vld [vmem:[#allocation2 + $0x10] sm:$0xff]  ;;  %v35_v6 = vld [vmem:[#allocation2 + $0x18] sm:$0xff]  ;;  %vm344_vm4 = vcmask 261120   ;;  %vm738_vm9 = vcmask 523264  }
  0x14   :  { %1676 = vmatprep.subr.bf16.mxu1 %v1971_v0  ;;  %1411 = vmatprep.mubr.msk.f32.mxu1 %vm1972_vm0, %v1973_v1  ;;  %v1653_v5 = vpack.c.bf16 %v33_v3, %v32_v2  ;;  %v1656_v7 = vpack.c.bf16 %v35_v6, %v34_v4  ;;  %v36_v8 = vld [vmem:[#allocation2 + $0x20] sm:$0xff]  ;;  %v37_v9 = vld [vmem:[#allocation2 + $0x28] sm:$0xff]  ;;  %v131_v11 = vld [vmem:[#allocation2 + $0x118] sm:$0xff] }
  0x15   :  { %v1659_v10 = vpack.c.bf16 %v37_v9, %v36_v8  ;;  %v38_v12 = vld [vmem:[#allocation2 + $0x30] sm:$0xff]  ;;  %v39_v13 = vld [vmem:[#allocation2 + $0x38] sm:$0xff]  ;;  %v132_v14 = vld [vmem:[#allocation2 + $0x120] sm:$0xff] }
  0x16   :  { %1654 = vmatpush3.bf16.msra.mxu0 %v1653_v5  ;;  %v1677_v15 = vpack.c.bf16 %v132_v14, %v131_v11  ;;  %v133_v16 = vld [vmem:[#allocation2 + $0x128] sm:$0xff]  ;;  %v134_v17 = vld [vmem:[#allocation2 + $0x130] sm:$0xff]  ;;  %v1662_v18 = vpack.c.bf16 %v39_v13, %v38_v12  ;;  %v40_v19 = vld [vmem:[#allocation2 + $0x40] sm:$0xff] }
  0x17   :  { %1655 = vmatprep.subr.bf16.mxu0 %v1971_v0  ;;  %v1680_v20 = vpack.c.bf16 %v134_v17, %v133_v16  ;;  %v41_v21 = vld [vmem:[#allocation2 + $0x48] sm:$0xff]  ;;  %v135_v22 = vld [vmem:[#allocation2 + $0x138] sm:$0xff]  ;;  %v136_v23 = vld [vmem:[#allocation2 + $0x140] sm:$0xff] }
  0x18   :  { %1678 = vmatpush3.bf16.msra.mxu1 %v1677_v15  ;;  %v1665_v24 = vpack.c.bf16 %v41_v21, %v40_v19  ;;  %v42_v25 = vld [vmem:[#allocation2 + $0x50] sm:$0xff]  ;;  %v1683_v26 = vpack.c.bf16 %v136_v23, %v135_v22  ;;  %v43_v27 = vld [vmem:[#allocation2 + $0x58] sm:$0xff]  ;;  %v137_v28 = vld [vmem:[#allocation2 + $0x148] sm:$0xff] }
  0x19   :  { %1679 = vmatprep.subr.bf16.mxu1 %v1971_v0  ;;  %v138_v29 = vld [vmem:[#allocation2 + $0x150] sm:$0xff]  ;;  %v1668_v30 = vpack.c.bf16 %v43_v27, %v42_v25  ;;  %v44_v31 = vld [vmem:[#allocation2 + $0x60] sm:$0xff]  ;;  %v45_v33 = vld [vmem:[#allocation2 + $0x68] sm:$0xff] }
  0x1a   :  { %1657 = vmatpush3.bf16.msra.mxu0 %v1656_v7  ;;  %v1686_v32 = vpack.c.bf16 %v138_v29, %v137_v28  ;;  %v139_v34 = vld [vmem:[#allocation2 + $0x158] sm:$0xff]  ;;  %v140_v35 = vld [vmem:[#allocation2 + $0x160] sm:$0xff]  ;;  %v1671_v36 = vpack.c.bf16 %v45_v33, %v44_v31  ;;  %v46_v38 = vld [vmem:[#allocation2 + $0x70] sm:$0xff] }
  0x1b   :  { %1658 = vmatprep.subr.bf16.mxu0 %v1971_v0  ;;  %v1689_v37 = vpack.c.bf16 %v140_v35, %v139_v34  ;;  %v47_v39 = vld [vmem:[#allocation2 + $0x78] sm:$0xff]  ;;  %v226_v41 = vld [vmem:[#allocation2 + $0xa0] sm:$0xff]  ;;  %v227_v44 = vld [vmem:[#allocation2 + $0xa8] sm:$0xff] }
  0x1c   :  { %1681 = vmatpush3.bf16.msra.mxu1 %v1680_v20  ;;  %v225_v40 = vld [vmem:[#allocation2 + $0x98] sm:$0xff]  ;;  %v1674_v42 = vpack.c.bf16 %v47_v39, %v46_v38  ;;  %v228_v45 = vld [vmem:[#allocation2 + $0xb0] sm:$0xff]  ;;  %v25_v46 = vld [vmem:[%s2144_s0] sm:$0xff] }
  0x1d   :  { %1682 = vmatprep.subr.bf16.mxu1 %v1971_v0  ;;  %v1700_v43 = vpack.c.bf16 %v226_v41, %v225_v40  ;;  %v1704_v47 = vpack.c.bf16 %v228_v45, %v227_v44  ;;  %v229_v48 = vld [vmem:[#allocation2 + $0xb8] sm:$0xff]  ;;  %v230_v49 = vld [vmem:[#allocation2 + $0xc0] sm:$0xff]  ;;  %v26_v50 = vld [vmem:[%s2144_s0 + $0x8] sm:$0xff] }
  0x1e   :  { %1660 = vmatpush3.bf16.msra.mxu0 %v1659_v10  ;;  %v1708_v51 = vpack.c.bf16 %v230_v49, %v229_v48  ;;  %v231_v52 = vld [vmem:[#allocation2 + $0xc8] sm:$0xff]  ;;  %v232_v53 = vld [vmem:[#allocation2 + $0xd0] sm:$0xff]  ;;  %v233_v56 = vld [vmem:[#allocation2 + $0xd8] sm:$0xff] }
  0x1f   :  { %1661 = vmatprep.subr.bf16.mxu0 %v1971_v0  ;;  %v27_v54 = vld [vmem:[%s2144_s0 + $0x10] sm:$0xff]  ;;  %v1712_v55 = vpack.c.bf16 %v232_v53, %v231_v52  ;;  %v234_v57 = vld [vmem:[#allocation2 + $0xe0] sm:$0xff]  ;;  %v235_v59 = vld [vmem:[#allocation2 + $0xe8] sm:$0xff] }
  0x20   :  { %1684 = vmatpush3.bf16.msra.mxu1 %v1683_v26  ;;  %v1716_v58 = vpack.c.bf16 %v234_v57, %v233_v56  ;;  %v236_v60 = vld [vmem:[#allocation2 + $0xf0] sm:$0xff]  ;;  %v237_v62 = vld [vmem:[#allocation2 + $0xf8] sm:$0xff]  ;;  %v238_v63 = vld [vmem:[#allocation2 + $0x100] sm:$0xff] }
  0x21   :  { %1685 = vmatprep.subr.bf16.mxu1 %v1971_v0  ;;  %v1720_v61 = vpack.c.bf16 %v236_v60, %v235_v59  ;;  %v141_v2 = vld [vmem:[#allocation2 + $0x168] sm:$0xff]  ;;  %v142_v3 = vld [vmem:[#allocation2 + $0x170] sm:$0xff]  ;;  %v143_v8 = vld [vmem:[#allocation2 + $0x178] sm:$0xff] }
  0x22   :  { %1663 = vmatpush3.bf16.msra.mxu0 %v1662_v18  ;;  %v1692_v4 = vpack.c.bf16 %v142_v3, %v141_v2  ;;  %v239_v5 = vld [vmem:[#allocation2 + $0x108] sm:$0xff]  ;;  %v240_v6 = vld [vmem:[#allocation2 + $0x110] sm:$0xff]  ;;  %v144_v9 = vld [vmem:[#allocation2 + $0x180] sm:$0xff] }
  0x23   :  { %1664 = vmatprep.subr.bf16.mxu0 %v1971_v0  ;;  %v1728_v7 = vpack.c.bf16 %v240_v6, %v239_v5  ;;  %v1695_v10 = vpack.c.bf16 %v144_v9, %v143_v8  ;;  %v611_v11 = vld [vmem:[#allocation2 + $0x1c0] sm:$0xff]  ;;  %v612_v12 = vld [vmem:[#allocation2 + $0x1c8] sm:$0xff]  ;;  %v146_v15 = vld [vmem:[#allocation2 + $0x190] sm:$0xff] }
  0x24   :  { %1687 = vmatpush3.bf16.msra.mxu1 %v1686_v32  ;;  %v1780_v13 = vpack.c.bf16 %v612_v12, %v611_v11  ;;  %v145_v14 = vld [vmem:[#allocation2 + $0x188] sm:$0xff]  ;;  %v48_v17 = vld [vmem:[#allocation2 + $0x80] sm:$0xff]  ;;  %v613_v22 = vld [vmem:[#allocation2 + $0x1d0] sm:$0xff] }
  0x25   :  { %1688 = vmatprep.subr.bf16.mxu1 %v1971_v0  ;;  %v1698_v16 = vpack.c.bf16 %v146_v15, %v145_v14  ;;  %v49_v21 = vld [vmem:[#allocation2 + $0x88] sm:$0xff]  ;;  %v614_v23 = vld [vmem:[#allocation2 + $0x1d8] sm:$0xff]  ;;  %v50_v27 = vld [vmem:[#allocation2 + $0x90] sm:$0xff] }
  0x26   :  { %1666 = vmatpush3.bf16.msra.mxu0 %v1665_v24  ;;  %v615_v28 = vld [vmem:[#allocation2 + $0x1e0] sm:$0xff]  ;;  %v616_v29 = vld [vmem:[#allocation2 + $0x1e8] sm:$0xff]  ;;  %v2045_v33 = vld [vmem:[#allocation2 + $0x1b0] sm:$0xff] }
  0x27   :  { %1667 = vmatprep.subr.bf16.mxu0 %v1971_v0  ;;  %v2043_v32 = vld [vmem:[#allocation2 + $0x1a8] sm:$0xff]  ;;  %v2047_v34 = vld [vmem:[#allocation2 + $0x1b8] sm:$0xff]  ;;  %v617_v38 = vld [vmem:[#allocation2 + $0x1f0] sm:$0xff] }
  0x28   :  { %1690 = vmatpush3.bf16.msra.mxu1 %v1689_v37  ;;  %v1788_v37 = vpack.c.bf16 %v616_v29, %v615_v28  ;;  %v618_v39 = vld [vmem:[#allocation2 + $0x1f8] sm:$0xff]  ;;  %v623_v53 = vld [vmem:[#allocation2 + $0x220] sm:$0xff]  ;;  %v625_v56 = vld [vmem:[#allocation2 + $0x230] sm:$0xff]  ;;  %v1744_v29 = vpack.c.bf16 %v2047_v34, %v2045_v33 }
  0x29   :  { %1691 = vmatprep.subr.bf16.mxu1 %v1971_v0  ;;  %v1792_v45 = vpack.c.bf16 %v618_v39, %v617_v38  ;;  %v626_v57 = vld [vmem:[#allocation2 + $0x238] sm:$0xff]  ;;  %v513_v39 = vld [vmem:[#allocation2 + $0x260] sm:$0xff] }
  0x2a   :  { %1669 = vmatpush3.bf16.msra.mxu0 %v1668_v30  ;;  %v2040_v30 = vld [vmem:[#allocation2 + $0x1a0] sm:$0xff] }
  0x2b   :  { %1670 = vmatprep.subr.bf16.mxu0 %v1971_v0 }
  0x2c   :  { %1693 = vmatpush3.bf16.msra.mxu1 %v1692_v4 }
  0x2d   :  { %1694 = vmatprep.subr.bf16.mxu1 %v1971_v0 }
  0x2e   :  { %1672 = vmatpush3.bf16.msra.mxu0 %v1671_v36 }
  0x2f   :  { %1673 = vmatprep.subr.bf16.mxu0 %v1971_v0 }
  0x30   :  { %1696 = vmatpush3.bf16.msra.mxu1 %v1695_v10 }
  0x31   :  { %1697 = vmatprep.subr.bf16.mxu1 %v1971_v0  ;;  %v1784_v0 = vpack.c.bf16 %v614_v23, %v613_v22 }
  0x32   :  { %1675 = vmatpush3.bf16.msra.mxu0 %v1674_v42 }
  0x33   :  { %1701 = vmatprep.subr.bf16.mxu0 %v1700_v43 }
  0x34   :  { %1699 = vmatpush3.bf16.msra.mxu1 %v1698_v16  ;;  %v1740_v16 = vpack.c.bf16 %v2043_v32, %v2040_v30 }
  0x35   :  { %1371 = vmatmul.mubr.f32.vlgmr.msra.gmra.mrb[0].mxu0 %v25_v46  ;;  %v619_v46 = vld [vmem:[#allocation2 + $0x200] sm:$0xff] }
  0x36   :  { %1373 = vmatprep.mubr.msk.f32.mxu0 %vm1972_vm0, %v1973_v1  ;;  %1703 = vmatpush3.bf16.msra.mxu0 %v1700_v43 }
  0x37   :  { %1705 = vmatprep.subr.bf16.mxu0 %v1704_v47 }
  0x39   :  { %1374 = vmatmul.mubr.f32.gmra.mrb[2].mxu0 %v26_v50  ;;  %v621_v50 = vld [vmem:[#allocation2 + $0x210] sm:$0xff] }
  0x3a   :  { %1376 = vmatprep.mubr.msk.f32.mxu0 %vm1972_vm0, %v1973_v1  ;;  %1707 = vmatpush3.bf16.msra.mxu0 %v1704_v47  ;;  %v1724_v1 = vpack.c.bf16 %v238_v63, %v237_v62  ;;  %v620_v47 = vld [vmem:[#allocation2 + $0x208] sm:$0xff] }
  0x3b   :  { %1709 = vmatprep.subr.bf16.mxu0 %v1708_v51  ;;  %v1796_v49 = vpack.c.bf16 %v620_v47, %v619_v46  ;;  %v519_v46 = vld [vmem:[#allocation2 + $0x290] sm:$0xff]  ;;  %v520_v47 = vld [vmem:[#allocation2 + $0x298] sm:$0xff] }
  0x3d   :  { %1377 = vmatmul.mubr.f32.gmra.mrb[4].mxu0 %v27_v54  ;;  %v624_v54 = vld [vmem:[#allocation2 + $0x228] sm:$0xff] }
  0x3e   :  { %1711 = vmatpush3.bf16.msra.mxu0 %v1708_v51  ;;  %v622_v51 = vld [vmem:[#allocation2 + $0x218] sm:$0xff] }
  0x3f   :  { %1713 = vmatprep.subr.bf16.mxu0 %v1712_v55  ;;  %v1800_v52 = vpack.c.bf16 %v622_v51, %v621_v50  ;;  %v522_v50 = vld [vmem:[#allocation2 + $0x2a8] sm:$0xff] }
  0x42   :  { %1715 = vmatpush3.bf16.msra.mxu0 %v1712_v55  ;;  %v1804_v55 = vpack.c.bf16 %v624_v54, %v623_v53  ;;  %v524_v53 = vld [vmem:[#allocation2 + $0x2b8] sm:$0xff] }
  0x43   :  { %1717 = vmatprep.subr.bf16.mxu0 %v1716_v58  ;;  %v2073_v54 = vld [vmem:[#allocation2 + $0x2d8] sm:$0xff] }
  0x46   :  { %1719 = vmatpush3.bf16.msra.mxu0 %v1716_v58  ;;  %v1808_v58 = vpack.c.bf16 %v626_v57, %v625_v56  ;;  %v2075_v56 = vld [vmem:[#allocation2 + $0x2d0] sm:$0xff] }
  0x47   :  { %1721 = vmatprep.subr.bf16.mxu0 %v1720_v61 }
  0x4a   :  { %1723 = vmatpush3.bf16.msra.mxu0 %v1720_v61  ;;  %v217_v61 = vld [vmem:[#allocation2 + $0x198] sm:$0xff] }
  0x4b   :  { %1725 = vmatprep.subr.bf16.mxu0 %v1724_v1 }
  0x4e   :  { %1727 = vmatpush3.bf16.msra.mxu0 %v1724_v1 }
  0x4f   :  { %1729 = vmatprep.subr.bf16.mxu0 %v1728_v7 }
  0x52   :  { %1731 = vmatpush3.bf16.msra.mxu0 %v1728_v7 }
  0x53   :  { %1781 = vmatprep.subr.bf16.mxu0 %v1780_v13 }
 0x108   :  { %v117_v18 = vpop.f32.mrb[0].mxu0 }
 0x109   :  { %v2034_v19 = vadd.f32 %v117_v18, %v48_v17  ;;  %v1372_v20 = vpop.f32.mrb[1].mxu0 }
 0x10b   :  { %1446 = vmatprep.mubr.f32.mxu0 %v2034_v19 }
 0x10c   :  { %v122_v24 = vpop.f32.mrb[2].mxu0 }
 0x10d   :  { %v2037_v25 = vadd.f32 %v122_v24, %v49_v21  ;;  %v1375_v26 = vpop.f32.mrb[3].mxu0  ;;  %v28_v24 = vld [vmem:[%s2144_s0 + $0x18] sm:$0xff] }
 0x10e   :  { %vm326_vm3 = vcmp.gt.f32.partialorder %v28_v24, 0.0  ;;  %v29_v26 = vld [vmem:[%s2144_s0 + $0x20] sm:$0xff]  ;;  %v601_v24 = vld [vmem:[#allocation2 + $0x2c8] sm:$0xff] }
 0x10f   :  { %1447 = vmatmul.mubr.f32.vlgmr.msra.gmra.mrb[6].mxu0 %v2037_v25  ;;  %vm327_vm5 = vcmp.gt.f32.partialorder %v29_v26, 0.0  ;;  %v731_v57 = vmul.f32 %v2073_v54, %v2037_v25 }
 0x110   :  { %1783 = vmatpush3.bf16.msra.mxu0 %v1780_v13  ;;  %v127_v31 = vpop.f32.mrb[4].mxu0  ;;  %1538 = vmatprep.mubr.f32.mxu0 %v2034_v19 }
 0x111   :  { %v128_v35 = vadd.f32 %v127_v31, %v50_v27  ;;  %v1378_v36 = vpop.f32.mrb[5].mxu0  ;;  %1785 = vmatprep.subr.bf16.mxu0 %v1784_v0  ;;  %v509_v31 = vld [vmem:[#allocation2 + $0x240] sm:$0xff] }
 0x112   :  { %v511_v36 = vld [vmem:[#allocation2 + $0x250] sm:$0xff] }
 0x113   :  { %1412 = vmatmul.mubr.f32.vlgmr.msra.gmra.mrb[0].mxu1 %v128_v35  ;;  %v340_v40 = vmul.f32 %v2040_v30, %v128_v35  ;;  %v341_v41 = vmul.f32 %v2043_v32, %v128_v35  ;;  %v342_v42 = vmul.f32 %v2045_v33, %v128_v35  ;;  %v343_v43 = vmul.f32 %v2047_v34, %v128_v35  ;;  %v510_v32 = vld [vmem:[#allocation2 + $0x248] sm:$0xff]  ;;  %v515_v34 = vld [vmem:[#allocation2 + $0x270] sm:$0xff] }
 0x114   :  { %1787 = vmatpush3.bf16.msra.mxu0 %v1784_v0  ;;  %v1748_v35 = vpack.c.bf16 %v510_v32, %v509_v31 }
 0x115   :  { %1789 = vmatprep.subr.bf16.mxu0 %v1788_v37  ;;  %v1732_v44 = vpack.c.bf16 %v341_v41, %v340_v40  ;;  %v1736_v48 = vpack.c.bf16 %v343_v43, %v342_v42  ;;  %v514_v40 = vld [vmem:[#allocation2 + $0x268] sm:$0xff]  ;;  %v516_v41 = vld [vmem:[#allocation2 + $0x278] sm:$0xff]  ;;  %v517_v43 = vld [vmem:[#allocation2 + $0x280] sm:$0xff] }
 0x116   :  { %v1756_v33 = vpack.c.bf16 %v514_v40, %v513_v39  ;;  %v1760_v42 = vpack.c.bf16 %v516_v41, %v515_v34 }
 0x117   :  { %1733 = vmatprep.subr.bf16.mxu1 %v1732_v44 }
 0x118   :  { %1791 = vmatpush3.bf16.msra.mxu0 %v1788_v37  ;;  %1735 = vmatpush3.bf16.msra.mxu1 %v1732_v44  ;;  %v512_v37 = vld [vmem:[#allocation2 + $0x258] sm:$0xff]  ;;  %v518_v44 = vld [vmem:[#allocation2 + $0x288] sm:$0xff] }
 0x119   :  { %1737 = vmatprep.subr.bf16.mxu1 %v1736_v48  ;;  %1793 = vmatprep.subr.bf16.mxu0 %v1792_v45  ;;  %v1752_v38 = vpack.c.bf16 %v512_v37, %v511_v36 }
 0x11c   :  { %1795 = vmatpush3.bf16.msra.mxu0 %v1792_v45  ;;  %1739 = vmatpush3.bf16.msra.mxu1 %v1736_v48  ;;  %v1764_v45 = vpack.c.bf16 %v518_v44, %v517_v43  ;;  %v1768_v48 = vpack.c.bf16 %v520_v47, %v519_v46  ;;  %v903_v44 = vld [vmem:[#allocation2 + $0x310] sm:$0xff] }
 0x11d   :  { %1797 = vmatprep.subr.bf16.mxu0 %v1796_v49  ;;  %1741 = vmatprep.subr.bf16.mxu1 %v1740_v16 }
 0x120   :  { %1799 = vmatpush3.bf16.msra.mxu0 %v1796_v49  ;;  %v521_v49 = vld [vmem:[#allocation2 + $0x2a0] sm:$0xff] }
 0x121   :  { %1801 = vmatprep.subr.bf16.mxu0 %v1800_v52  ;;  %v1772_v51 = vpack.c.bf16 %v522_v50, %v521_v49 }
 0x124   :  { %1803 = vmatpush3.bf16.msra.mxu0 %v1800_v52  ;;  %v523_v52 = vld [vmem:[#allocation2 + $0x2b0] sm:$0xff] }
 0x125   :  { %1805 = vmatprep.subr.bf16.mxu0 %v1804_v55 }
 0x128   :  { %1807 = vmatpush3.bf16.msra.mxu0 %v1804_v55  ;;  %v1776_v55 = vpack.c.bf16 %v524_v53, %v523_v52  ;;  %v30_v53 = vld [vmem:[%s2144_s0 + $0x28] sm:$0xff] }
 0x129   :  { %1809 = vmatprep.subr.bf16.mxu0 %v1808_v58  ;;  %vm712_vm8 = vcmp.gt.f32.partialorder %v30_v53, 0.0  ;;  %v1066_v53 = vld [vmem:[#allocation2 + $0x3b0] sm:$0xff] }
 0x12c   :  { %1811 = vmatpush3.bf16.msra.mxu0 %v1808_v58  ;;  %v2079_v58 = vld [vmem:[#allocation2 + $0x2e8] sm:$0xff] }
 0x12f   :  { %1539 = vmatmul.mubr.f32.vlgmr.msra.gmra.mrb[8].mxu0 %v2037_v25 }
 0x1e2   :  { %v1448_v59 = vpop.f32.mrb[6].mxu0 }
 0x1e3   :  { %v307_v60 = vpop.f32.mrb[7].mxu0 }
 0x1e6   :  { %v213_v62 = vpop.f32.mrb[0].mxu1 }
 0x1e7   :  { %v218_v63 = vmul.f32 %v217_v61, %v213_v62  ;;  %v1413_v1 = vpop.f32.mrb[1].mxu1  ;;  %v733_v62 = vmul.f32 %v2079_v58, %v2037_v25 }
 0x1e9   :  { %v219_v2 = vrot.slane %v218_v63, 4 }
 0x1eb   :  { %v220_v3 = vadd.f32 %v219_v2, %v218_v63  ;;  %v727_v63 = vld [vmem:[#allocation2 + $0x2f8] sm:$0xff]  ;;  %v726_v2 = vld [vmem:[#allocation2 + $0x2f0] sm:$0xff] }
 0x1ed   :  { %v221_v4 = vrot.slane %v220_v3, 2 }
 0x1ef   :  { %v222_v5 = vadd.f32 %v221_v4, %v220_v3  ;;  %v735_v4 = vmul.f32 %v727_v63, %v2037_v25 }
 0x1f1   :  { %v223_v6 = vrot.slane %v222_v5, 1 }
 0x1f3   :  { %v224_v7 = vadd.f32 %v223_v6, %v222_v5  ;;  %v729_v5 = vld [vmem:[#allocation2 + $0x308] sm:$0xff]  ;;  %v734_v6 = vmul.f32 %v726_v2, %v2034_v19 }
 0x1f5   :  { %v308_v8 = vadd.f32 %v307_v60, %v224_v7  ;;  %v313_v9 = vadd.f32 %v1448_v59, %v224_v7  ;;  %v730_v59 = vmul.f32 %v2075_v56, %v2034_v19  ;;  %v2083_v60 = vld [vmem:[#allocation2 + $0x2e0] sm:$0xff] }
 0x1f6   :  { %v732_v1 = vmul.f32 %v2083_v60, %v2034_v19  ;;  %v728_v7 = vld [vmem:[#allocation2 + $0x300] sm:$0xff]  ;;  %v1832_v43 = vpack.c.bf16 %v2079_v58, %v2083_v60  ;;  %v906_v58 = vld [vmem:[#allocation2 + $0x328] sm:$0xff] }
 0x1f7   :  { %vm316_vm1 = vcmp.ge.f32.partialorder %v308_v8, 0.0  ;;  %v318_v10 = vmul.f32 0.2, %v308_v8  ;;  %v319_v12 = vmul.f32 0.2, %v313_v9  ;;  %vm317_vm2 = vcmp.ge.f32.partialorder %v313_v9, 0.0 }
 0x1f8   :  { %v1812_v61 = vpack.c.bf16 %v731_v57, %v730_v59  ;;  %v1816_v3 = vpack.c.bf16 %v733_v62, %v732_v1  ;;  %v905_v57 = vld [vmem:[#allocation2 + $0x320] sm:$0xff]  ;;  %v908_v1 = vld [vmem:[#allocation2 + $0x338] sm:$0xff] }
 0x1f9   :  { %v320_v11 = vsel %vm316_vm1, %v308_v8, %v318_v10  ;;  %v321_v13 = vsel %vm317_vm2, %v313_v9, %v319_v12  ;;  %v1820_v8 = vpack.c.bf16 %v735_v4, %v734_v6  ;;  %v737_v9 = vmul.f32 %v729_v5, %v2037_v25  ;;  %v910_v4 = vld [vmem:[#allocation2 + $0x348] sm:$0xff]  ;;  %v911_v6 = vld [vmem:[#allocation2 + $0x350] sm:$0xff] }
 0x1fa   :  { %322 = vmax.xlane.f32.xlu0 %v320_v11  ;;  %v736_v10 = vmul.f32 %v728_v7, %v2034_v19  ;;  %v1848_v60 = vpack.c.bf16 %v906_v58, %v905_v57  ;;  %v1069_v57 = vld [vmem:[#allocation2 + $0x3c8] sm:$0xff] }
 0x1fe   :  { %324 = vmax.xlane.f32.xlu0 %v321_v13 }
 0x202   :  { %v2054_v14 = vpop.f32.mrb[8].mxu0 }
 0x203   :  { %v2056_v15 = vpop.f32.mrb[9].mxu0 }
 0x287   :  { %v323_v17 = vpop.xlane.xlu0 %322 }
 0x288   :  { %v328_v18 = vsub.f32 %v320_v11, %v323_v17  ;;  %v1824_v11 = vpack.c.bf16 %v737_v9, %v736_v10  ;;  %v913_v9 = vld [vmem:[#allocation2 + $0x360] sm:$0xff]  ;;  %v914_v10 = vld [vmem:[#allocation2 + $0x368] sm:$0xff] }
 0x28a   :  { %v330_v20 = vmul.f32 1.442695, %v328_v18 }
 0x28b   :  { %v325_v21 = vpop.xlane.xlu0 %324 }
 0x28c   :  { %1914 = vpow2.f32 %v330_v20  ;;  %v329_v22 = vsub.f32 %v321_v13, %v325_v21 }
 0x28e   :  { %v332_v23 = vmul.f32 1.442695, %v329_v22 }
 0x290   :  { %1916 = vpow2.f32 %v332_v23 }
 0x296   :  { %v1915_v0 = vpop.eup %1914 }
 0x297   :  { %v334_v27 = vsel %vm326_vm3, %v1915_v0, 0.0 }
 0x298   :  { %1457 = vmatprep.mubr.msk.f32.mxu1 %vm344_vm4, %v334_v27 }
 0x29a   :  { %v1917_v28 = vpop.eup %1916 }
 0x29b   :  { %v335_v30 = vsel %vm327_vm5, %v1917_v28, 0.0 }
 0x29c   :  { %1458 = vmatmul.mubr.msk.f32.vlgmr.msra.gmra.mrb[2].mxu1 %vm344_vm4, %v335_v30 }
 0x29d   :  { %1743 = vmatpush3.bf16.msra.mxu1 %v1740_v16  ;;  %1468 = vmatprep.mubr.msk.f32.mxu1 %vm344_vm4, %v334_v27 }
 0x29e   :  { %1745 = vmatprep.subr.bf16.mxu1 %v1744_v29 }
 0x2a1   :  { %1747 = vmatpush3.bf16.msra.mxu1 %v1744_v29 }
 0x2a2   :  { %1749 = vmatprep.subr.bf16.mxu1 %v1748_v35 }
 0x2a4   :  { %1469 = vmatmul.mubr.msk.f32.vlgmr.msra.gmra.mrb[4].mxu1 %vm344_vm4, %v335_v30 }
 0x2a5   :  { %1751 = vmatpush3.bf16.msra.mxu1 %v1748_v35  ;;  %1503 = vmatprep.mubr.f32.mxu1 %v2034_v19  ;;  %v600_v19 = vld [vmem:[#allocation2 + $0x2c0] sm:$0xff] }
 0x2a6   :  { %1753 = vmatprep.subr.bf16.mxu1 %v1752_v38 }
 0x2a9   :  { %1755 = vmatpush3.bf16.msra.mxu1 %v1752_v38 }
 0x2aa   :  { %1757 = vmatprep.subr.bf16.mxu1 %v1756_v33 }
 0x2ad   :  { %1759 = vmatpush3.bf16.msra.mxu1 %v1756_v33 }
 0x2ae   :  { %1761 = vmatprep.subr.bf16.mxu1 %v1760_v42 }
 0x2b1   :  { %1763 = vmatpush3.bf16.msra.mxu1 %v1760_v42  ;;  %v1828_v42 = vpack.c.bf16 %v2073_v54, %v2075_v56  ;;  %v31_v54 = vld [vmem:[%s2144_s0 + $0x30] sm:$0xff] }
 0x2b2   :  { %1765 = vmatprep.subr.bf16.mxu1 %v1764_v45  ;;  %vm713_vm10 = vcmp.gt.f32.partialorder %v31_v54, 0.0  ;;  %v1067_v54 = vld [vmem:[#allocation2 + $0x3b8] sm:$0xff] }
 0x2b3   :  { %1829 = vmatprep.subr.bf16.mxu0 %v1828_v42 }
 0x2b4   :  { %1831 = vmatpush3.bf16.msra.mxu0 %v1828_v42 }
 0x2b5   :  { %1767 = vmatpush3.bf16.msra.mxu1 %v1764_v45  ;;  %1833 = vmatprep.subr.bf16.mxu0 %v1832_v43  ;;  %v904_v45 = vld [vmem:[#allocation2 + $0x318] sm:$0xff] }
 0x2b6   :  { %1769 = vmatprep.subr.bf16.mxu1 %v1768_v48  ;;  %v1844_v46 = vpack.c.bf16 %v904_v45, %v903_v44 }
 0x2b8   :  { %1835 = vmatpush3.bf16.msra.mxu0 %v1832_v43 }
 0x2b9   :  { %1771 = vmatpush3.bf16.msra.mxu1 %v1768_v48 }
 0x2ba   :  { %1773 = vmatprep.subr.bf16.mxu1 %v1772_v51 }
 0x2bd   :  { %1775 = vmatpush3.bf16.msra.mxu1 %v1772_v51 }
 0x2be   :  { %1777 = vmatprep.subr.bf16.mxu1 %v1776_v55 }
 0x2c1   :  { %1779 = vmatpush3.bf16.msra.mxu1 %v1776_v55 }
 0x2c2   :  { %1813 = vmatprep.subr.bf16.mxu1 %v1812_v61 }
 0x2c4   :  { %1504 = vmatmul.mubr.f32.vlgmr.msra.gmra.mrb[6].mxu1 %v2037_v25 }
 0x2c5   :  { %1815 = vmatpush3.bf16.msra.mxu1 %v1812_v61 }
 0x2c6   :  { %1817 = vmatprep.subr.bf16.mxu1 %v1816_v3 }
 0x2c9   :  { %1819 = vmatpush3.bf16.msra.mxu1 %v1816_v3  ;;  %v909_v3 = vld [vmem:[#allocation2 + $0x340] sm:$0xff] }
 0x2ca   :  { %1821 = vmatprep.subr.bf16.mxu1 %v1820_v8 }
 0x2cd   :  { %1823 = vmatpush3.bf16.msra.mxu1 %v1820_v8 }
 0x2ce   :  { %1825 = vmatprep.subr.bf16.mxu1 %v1824_v11 }
 0x2d1   :  { %1827 = vmatpush3.bf16.msra.mxu1 %v1824_v11  ;;  %v1864_v11 = vpack.c.bf16 %v914_v10, %v913_v9  ;;  %v1078_v9 = vld [vmem:[#allocation2 + $0x410] sm:$0xff]  ;;  %v1079_v10 = vld [vmem:[#allocation2 + $0x418] sm:$0xff] }
 0x2d2   :  { %1845 = vmatprep.subr.bf16.mxu1 %v1844_v46 }
 0x36f   :  { %v1459_v12 = vpop.f32.mrb[2].mxu1 }
 0x370   :  { %v417_v13 = vpop.f32.mrb[3].mxu1 }
 0x377   :  { %v1470_v16 = vpop.f32.mrb[4].mxu1 }
 0x378   :  { %v502_v17 = vmax.f32 %v1470_v16, 1e-20  ;;  %v492_v18 = vpop.f32.mrb[5].mxu1 }
 0x379   :  { %v501_v20 = vmax.f32 %v492_v18, 1e-20  ;;  %v918_v18 = vld [vmem:[#allocation2 + $0x388] sm:$0xff] }
 0x37a   :  { %1918 = vrcp.f32 %v502_v17  ;;  %v917_v17 = vld [vmem:[#allocation2 + $0x380] sm:$0xff] }
 0x37b   :  { %1920 = vrcp.f32 %v501_v20  ;;  %v1872_v20 = vpack.c.bf16 %v918_v18, %v917_v17 }
 0x384   :  { %v1919_v21 = vpop.eup %1918 }
 0x385   :  { %v1921_v22 = vpop.eup %1920  ;;  %v2094_v23 = vmul.f32 %v1919_v21, %v1459_v12  ;;  %v915_v12 = vld [vmem:[#allocation2 + $0x370] sm:$0xff] }
 0x386   :  { %v2096_v25 = vmul.f32 %v1921_v22, %v417_v13  ;;  %v916_v13 = vld [vmem:[#allocation2 + $0x378] sm:$0xff] }
 0x387   :  { %v1868_v16 = vpack.c.bf16 %v916_v13, %v915_v12  ;;  %v508_v21 = vmax.f32 %v2094_v23, 0.0 }
 0x388   :  { %v507_v62 = vmax.f32 %v2096_v25, 0.0 }
 0x397   :  { %v1505_v26 = vpop.f32.mrb[6].mxu1 }
 0x398   :  { %v603_v0 = vmul.f32 %v1505_v26, %v601_v24  ;;  %v591_v27 = vpop.f32.mrb[7].mxu1 }
 0x399   :  { %v602_v28 = vmul.f32 %v600_v19, %v591_v27 }
 0x39b   :  { %v604_v29 = vadd.f32 %v603_v0, %v602_v28 }
 0x39d   :  { %v605_v30 = vrot.slane %v604_v29, 4 }
 0x39f   :  { %v606_v31 = vadd.f32 %v605_v30, %v604_v29 }
 0x3a1   :  { %v607_v32 = vrot.slane %v606_v31, 2 }
 0x3a3   :  { %v608_v35 = vadd.f32 %v607_v32, %v606_v31 }
 0x3a5   :  { %v609_v36 = vrot.slane %v608_v35, 1 }
 0x3a7   :  { %v610_v37 = vadd.f32 %v609_v36, %v608_v35  ;;  %v1175_v36 = vld [vmem:[#allocation2 + $0x390] ss:$0 sm:$0xff] }
 0x3a9   :  { %v694_v38 = vadd.f32 %v2056_v15, %v610_v37  ;;  %v699_v39 = vadd.f32 %v2054_v14, %v610_v37  ;;  %v1836_v15 = vpack.c.bf16 %v727_v63, %v726_v2  ;;  %v1840_v14 = vpack.c.bf16 %v729_v5, %v728_v7  ;;  %v907_v63 = vld [vmem:[#allocation2 + $0x330] sm:$0xff]  ;;  %v912_v7 = vld [vmem:[#allocation2 + $0x358] sm:$0xff] }
 0x3aa   :  { %v1852_v2 = vpack.c.bf16 %v908_v1, %v907_v63  ;;  %v1856_v5 = vpack.c.bf16 %v910_v4, %v909_v3  ;;  %v1860_v8 = vpack.c.bf16 %v912_v7, %v911_v6  ;;  %v1072_v63 = vld [vmem:[#allocation2 + $0x3e0] sm:$0xff]  ;;  %v1073_v1 = vld [vmem:[#allocation2 + $0x3e8] sm:$0xff]  ;;  %v1074_v3 = vld [vmem:[#allocation2 + $0x3f0] sm:$0xff] }
 0x3ab   :  { %vm702_vm6 = vcmp.ge.f32.partialorder %v694_v38, 0.0  ;;  %v704_v40 = vmul.f32 0.2, %v694_v38  ;;  %v705_v34 = vmul.f32 0.2, %v699_v39  ;;  %vm703_vm7 = vcmp.ge.f32.partialorder %v699_v39, 0.0  ;;  %1837 = vmatprep.subr.bf16.mxu0 %v1836_v15 }
 0x3ac   :  { %1839 = vmatpush3.bf16.msra.mxu0 %v1836_v15  ;;  %v1075_v4 = vld [vmem:[#allocation2 + $0x3f8] sm:$0xff]  ;;  %v1076_v6 = vld [vmem:[#allocation2 + $0x400] sm:$0xff]  ;;  %v1077_v7 = vld [vmem:[#allocation2 + $0x408] sm:$0xff] }
 0x3ad   :  { %v706_v33 = vsel %vm702_vm6, %v694_v38, %v704_v40  ;;  %v707_v41 = vsel %vm703_vm7, %v699_v39, %v705_v34  ;;  %1841 = vmatprep.subr.bf16.mxu0 %v1840_v14 }
 0x3ae   :  { %708 = vmax.xlane.f32.xlu1 %v706_v33 }
 0x3b0   :  { %1843 = vmatpush3.bf16.msra.mxu0 %v1840_v14 }
 0x3b2   :  { %710 = vmax.xlane.f32.xlu1 %v707_v41 }
 0x43b   :  { %v709_v47 = vpop.xlane.xlu1 %708 }
 0x43c   :  { %v714_v48 = vsub.f32 %v706_v33, %v709_v47  ;;  %v1176_v33 = vld [vmem:[#allocation2 + $0x398] ss:$0 sm:$0xff] }
 0x43e   :  { %v716_v49 = vmul.f32 1.442695, %v714_v48 }
 0x43f   :  { %v711_v50 = vpop.xlane.xlu1 %710 }
 0x440   :  { %1922 = vpow2.f32 %v716_v49  ;;  %v715_v51 = vsub.f32 %v707_v41, %v711_v50  ;;  %v1064_v50 = vld [vmem:[#allocation2 + $0x3a0] sm:$0xff] }
 0x442   :  { %v718_v52 = vmul.f32 1.442695, %v715_v51  ;;  %v1065_v51 = vld [vmem:[#allocation2 + $0x3a8] sm:$0xff] }
 0x444   :  { %1924 = vpow2.f32 %v718_v52  ;;  %v1876_v52 = vpack.c.bf16 %v1065_v51, %v1064_v50 }
 0x446   :  { %1877 = vmatprep.subr.bf16.mxu0 %v1876_v52 }
 0x44a   :  { %v1923_v55 = vpop.eup %1922 }
 0x44b   :  { %v720_v56 = vsel %vm712_vm8, %v1923_v55, 0.0  ;;  %v1068_v55 = vld [vmem:[#allocation2 + $0x3c0] sm:$0xff] }
 0x44c   :  { %1557 = vmatprep.mubr.msk.f32.mxu1 %vm738_vm9, %v720_v56  ;;  %1576 = vmatprep.mubr.msk.f32.mxu0 %vm738_vm9, %v720_v56  ;;  %v1880_v56 = vpack.c.bf16 %v1067_v54, %v1066_v53  ;;  %v1884_v58 = vpack.c.bf16 %v1069_v57, %v1068_v55  ;;  %v1177_v55 = vld [vmem:[#allocation2 + $0x420] ss:$0 sm:$0xff] }
 0x44e   :  { %v1925_v59 = vpop.eup %1924 }
 0x44f   :  { %v721_v61 = vsel %vm713_vm10, %v1925_v59, 0.0  ;;  %v1070_v59 = vld [vmem:[#allocation2 + $0x3d0] sm:$0xff] }
 0x450   :  { %1558 = vmatmul.mubr.msk.f32.vlgmr.msra.gmra.mrb[8].mxu1 %vm738_vm9, %v721_v61  ;;  %1577 = vmatmul.mubr.msk.f32.vlgmr.msra.gmra.mrb[10].mxu0 %vm738_vm9, %v721_v61 }
 0x451   :  { %1847 = vmatpush3.bf16.msra.mxu1 %v1844_v46  ;;  %1611 = vmatprep.mubr.f32.mxu1 %v507_v62 }
 0x452   :  { %1849 = vmatprep.subr.bf16.mxu1 %v1848_v60  ;;  %1879 = vmatpush3.bf16.msra.mxu0 %v1876_v52 }
 0x453   :  { %1881 = vmatprep.subr.bf16.mxu0 %v1880_v56 }
 0x455   :  { %1851 = vmatpush3.bf16.msra.mxu1 %v1848_v60  ;;  %v1071_v60 = vld [vmem:[#allocation2 + $0x3d8] sm:$0xff] }
 0x456   :  { %1853 = vmatprep.subr.bf16.mxu1 %v1852_v2  ;;  %1883 = vmatpush3.bf16.msra.mxu0 %v1880_v56  ;;  %v1888_v61 = vpack.c.bf16 %v1071_v60, %v1070_v59 }
 0x457   :  { %1885 = vmatprep.subr.bf16.mxu0 %v1884_v58 }
 0x459   :  { %1855 = vmatpush3.bf16.msra.mxu1 %v1852_v2  ;;  %v1892_v2 = vpack.c.bf16 %v1073_v1, %v1072_v63 }
 0x45a   :  { %1857 = vmatprep.subr.bf16.mxu1 %v1856_v5  ;;  %1887 = vmatpush3.bf16.msra.mxu0 %v1884_v58 }
 0x45b   :  { %1889 = vmatprep.subr.bf16.mxu0 %v1888_v61 }
 0x45d   :  { %1859 = vmatpush3.bf16.msra.mxu1 %v1856_v5  ;;  %v1896_v5 = vpack.c.bf16 %v1075_v4, %v1074_v3 }
 0x45e   :  { %1861 = vmatprep.subr.bf16.mxu1 %v1860_v8  ;;  %1891 = vmatpush3.bf16.msra.mxu0 %v1888_v61 }
 0x45f   :  { %1893 = vmatprep.subr.bf16.mxu0 %v1892_v2 }
 0x461   :  { %1863 = vmatpush3.bf16.msra.mxu1 %v1860_v8  ;;  %v1900_v8 = vpack.c.bf16 %v1077_v7, %v1076_v6 }
 0x462   :  { %1865 = vmatprep.subr.bf16.mxu1 %v1864_v11  ;;  %1895 = vmatpush3.bf16.msra.mxu0 %v1892_v2 }
 0x463   :  { %1897 = vmatprep.subr.bf16.mxu0 %v1896_v5 }
 0x465   :  { %1867 = vmatpush3.bf16.msra.mxu1 %v1864_v11  ;;  %v1904_v11 = vpack.c.bf16 %v1079_v10, %v1078_v9 }
 0x466   :  { %1869 = vmatprep.subr.bf16.mxu1 %v1868_v16  ;;  %1899 = vmatpush3.bf16.msra.mxu0 %v1896_v5 }
 0x467   :  { %1901 = vmatprep.subr.bf16.mxu0 %v1900_v8 }
 0x469   :  { %1871 = vmatpush3.bf16.msra.mxu1 %v1868_v16 }
 0x46a   :  { %1873 = vmatprep.subr.bf16.mxu1 %v1872_v20  ;;  %1903 = vmatpush3.bf16.msra.mxu0 %v1900_v8 }
 0x46b   :  { %1905 = vmatprep.subr.bf16.mxu0 %v1904_v11 }
 0x46d   :  { %1875 = vmatpush3.bf16.msra.mxu1 %v1872_v20 }
 0x46e   :  { %1907 = vmatpush3.bf16.msra.mxu0 %v1904_v11 }
 0x470   :  { %1612 = vmatmul.mubr.f32.vlgmr.msra.gmra.mrb[10].mxu1 %v508_v21 }
 0x523   :  { %v1559_v22 = vpop.f32.mrb[8].mxu1  ;;  %v1578_v24 = vpop.f32.mrb[10].mxu0 }
 0x524   :  { %v896_v19 = vmax.f32 %v1578_v24, 1e-20  ;;  %v811_v26 = vpop.f32.mrb[9].mxu1  ;;  %v886_v0 = vpop.f32.mrb[11].mxu0 }
 0x525   :  { %v895_v27 = vmax.f32 %v886_v0, 1e-20 }
 0x526   :  { %1926 = vrcp.f32 %v896_v19 }
 0x527   :  { %1928 = vrcp.f32 %v895_v27 }
 0x530   :  { %v1927_v28 = vpop.eup %1926 }
 0x531   :  { %v1929_v29 = vpop.eup %1928  ;;  %v2120_v30 = vmul.f32 %v1927_v28, %v1559_v22 }
 0x532   :  { %v2122_v31 = vmul.f32 %v1929_v29, %v811_v26 }
 0x533   :  { %v902_v35 = vmax.f32 %v2120_v30, 0.0 }
 0x534   :  { %v901_v32 = vmax.f32 %v2122_v31, 0.0 }
 0x536   :  { %1614 = vmatprep.mubr.f32.mxu1 %v901_v32 }
 0x537   :  { %1615 = vmatmul.mubr.f32.gmra.mrb[12].mxu1 %v902_v35 }
 0x543   :  { %v1613_v37 = vpop.f32.mrb[10].mxu1 }
 0x544   :  { %v996_v38 = vadd.f32 %v1613_v37, %v1175_v36  ;;  %v990_v39 = vpop.f32.mrb[11].mxu1 }
 0x545   :  { %v991_v40 = vadd.f32 %v1175_v36, %v990_v39 }
 0x546   :  { %1930 = vtanh.f32 %v996_v38 }
 0x547   :  { %1932 = vtanh.f32 %v991_v40 }
 0x550   :  { %v1931_v34 = vpop.eup %1930 }
 0x551   :  { %v1933_v41 = vpop.eup %1932  ;;  %v1019_v42 = vmul.f32 %v1931_v34, %v1176_v33 }
 0x552   :  { %v1018_v43 = vmul.f32 %v1933_v41, %v1176_v33 }
 0x553   :  { %1024 = vadd.xlane.f32.xlu1 %v1019_v42 }
 0x554   :  { %1022 = vadd.xlane.f32.xlu0 %v1018_v43 }
 0x5e0   :  { %v1025_v12 = vpop.xlane.xlu1 %1024 }
 0x5e1   :  { %v1023_v13 = vpop.xlane.xlu0 %1022 }
 0x5e2   :  { %v1030_v16 = vadd.f32 %v1025_v12, %v1023_v13 }
 0x5e4   :  { %v1031_v17 = vrot.slane %v1030_v16, 4 }
 0x5e6   :  { %v1032_v18 = vadd.f32 %v1031_v17, %v1030_v16 }
 0x5e8   :  { %v1033_v20 = vrot.slane %v1032_v18, 2 }
 0x5ea   :  { %v1034_v26 = vadd.f32 %v1033_v20, %v1032_v18 }
 0x5ec   :  { %v1035_v28 = vrot.slane %v1034_v26, 1 }
 0x5ee   :  { %v1036_v37 = vadd.f32 %v1035_v28, %v1034_v26 }
 0x5f0   :  { %v1038_v40 = vmul.f32 0.0625, %v1036_v37 }
 0x60a   :  { %v1616_v15 = vpop.f32.mrb[12].mxu1 }
 0x60b   :  { %v1006_v14 = vadd.f32 %v1616_v15, %v1175_v36  ;;  %v1000_v44 = vpop.f32.mrb[13].mxu1 }
 0x60c   :  { %v1001_v45 = vadd.f32 %v1175_v36, %v1000_v44 }
 0x60d   :  { %1934 = vtanh.f32 %v1006_v14 }
 0x60e   :  { %1936 = vtanh.f32 %v1001_v45 }
 0x617   :  { %v1935_v46 = vpop.eup %1934 }
 0x618   :  { %v1937_v47 = vpop.eup %1936  ;;  %v1021_v48 = vmul.f32 %v1935_v46, %v1176_v33 }
 0x619   :  { %v1020_v49 = vmul.f32 %v1937_v47, %v1176_v33 }
 0x61a   :  { %1028 = vadd.xlane.f32.xlu1 %v1021_v48 }
 0x61b   :  { %1026 = vadd.xlane.f32.xlu0 %v1020_v49 }
 0x6a7   :  { %v1029_v22 = vpop.xlane.xlu1 %1028 }
 0x6a8   :  { %v1027_v24 = vpop.xlane.xlu0 %1026 }
 0x6a9   :  { %v1039_v19 = vadd.f32 %v1029_v22, %v1027_v24 }
 0x6ab   :  { %v1040_v0 = vrot.slane %v1039_v19, 4 }
 0x6ad   :  { %v1041_v27 = vadd.f32 %v1040_v0, %v1039_v19 }
 0x6af   :  { %v1042_v29 = vrot.slane %v1041_v27, 2 }
 0x6b1   :  { %v1043_v36 = vadd.f32 %v1042_v29, %v1041_v27 }
 0x6b3   :  { %v1044_v38 = vrot.slane %v1043_v36, 1 }
 0x6b5   :  { %v1045_v39 = vadd.f32 %v1044_v38, %v1043_v36 }
 0x6b7   :  { %v1046_v33 = vmul.f32 0.0625, %v1045_v39 }
 0x6b9   :  { %v1047_v34 = vmax.f32 %v1038_v40, %v1046_v33 }
 0x6bb   :  { %v1048_v41 = vsub.f32 %v1038_v40, %v1047_v34  ;;  %v1051_v42 = vsub.f32 %v1046_v33, %v1047_v34 }
 0x6bd   :  { %v1049_v43 = vmul.f32 1.442695, %v1048_v41  ;;  %v1052_v15 = vmul.f32 1.442695, %v1051_v42 }
 0x6bf   :  { %1938 = vpow2.f32 %v1049_v43 }
 0x6c0   :  { %1940 = vpow2.f32 %v1052_v15 }
 0x6c9   :  { %v1939_v14 = vpop.eup %1938 }
 0x6ca   :  { %v1941_v44 = vpop.eup %1940 }
 0x6cb   :  { %v1054_v45 = vadd.f32 %v1941_v44, %v1939_v14 }
 0x6cd   :  { %1942 = vrcp.f32 %v1054_v45 }
 0x6d7   :  { %v1943_v46 = vpop.eup %1942 }
 0x6d8   :  { %v1056_v47 = vmul.f32 %v1943_v46, %v1939_v14  ;;  %v1059_v48 = vmul.f32 %v1943_v46, %v1941_v44 }
 0x6da   :  { %v1057_v49 = vmul.f32 %v1056_v47, %v507_v62  ;;  %v1060_v50 = vmul.f32 %v1059_v48, %v901_v32  ;;  %v1058_v51 = vmul.f32 %v1056_v47, %v508_v21  ;;  %v1061_v52 = vmul.f32 %v1059_v48, %v902_v35 }
 0x6dc   :  { %v1062_v53 = vadd.f32 %v1060_v50, %v1057_v49  ;;  %v1063_v54 = vadd.f32 %v1061_v52, %v1058_v51 }
 0x6de   :  { %1649 = vmatprep.mubr.f32.mxu0 %v1062_v53 }
 0x6df   :  { %1650 = vmatmul.mubr.f32.vlgmr.msra.gmra.mrb[12].mxu0 %v1063_v54 }
 0x7b2   :  { %v1651_v56 = vpop.f32.mrb[12].mxu0 }
 0x7b3   :  { %v1157_v57 = vadd.f32 %v1651_v56, %v1177_v55  ;;  %v1151_v58 = vpop.f32.mrb[13].mxu0 }
 0x7b4   :  { %v1152_v59 = vadd.f32 %v1177_v55, %v1151_v58 }
 0x7b5   :  { %1161 = vst [vmem:[%s2146_s2 + $0x8] sm:$0xff] %v1157_v57 }
 0x7b6   :  { %1160 = vst [vmem:[%s2146_s2] sm:$0xff] %v1152_v59 }
 0x7b7   :  { %1166 = vsyncpa [#allocation3], 1 }

</bundles_post_ra>
